<compile_context>
chip_gen: v5e
topology: v5e:2x2
jax: 0.10.0
libtpu: 0.0.40
codegen_flags: <defaults>
</compile_context>

<pallas_src>
import jax
import jax.numpy as jnp
from jax import lax
from jax.experimental import pallas as pl
from jax.experimental.pallas import tpu as pltpu


def _make_kernel(bb, negative_slope=0.1):
    def kernel(x_ref, w_ref, b_ref, o_ref):
        # x_ref: (Bb, Cin, TN)  lane-dense spatial tile(s)
        # w_ref: (Cout, Cin)    1x1 conv weight with BN scale pre-folded
        # b_ref: (Cout, 1)      folded BN shift (lane-broadcast)
        # o_ref: (Bb, Cout, TN)
        w = w_ref[...]
        bias = b_ref[...]
        for i in range(bb):  # trace-time unroll; bb is small (<= 8)
            x = x_ref[i]                                         # (Cin, TN)
            y = jnp.dot(w, x, preferred_element_type=jnp.float32)  # (Cout, TN)
            y = y + bias                                         # BN shift
            y = jnp.maximum(y, negative_slope * y)               # LeakyReLU(0.1)
            o_ref[i] = y.astype(o_ref.dtype)
    return kernel


def feature_out(x_nchw, params, eps=1e-5):
    """Forward of FeatureOut. x_nchw: (B, Cin, H, W) float32."""
    B, Cin, H, W = x_nchw.shape
    Cout = params["w"].shape[0]
    HW = H * W

    # ---- fold BN (eval) scale into the 1x1 conv weight; keep the shift ----
    w = params["w"][:, :, 0, 0]                                   # (Cout, Cin)
    scale = params["bn_gamma"] / jnp.sqrt(params["bn_var"] + eps)
    w_folded = w * scale[:, None]                                 # (Cout, Cin)
    shift = (params["bn_beta"] - params["bn_mean"] * scale).reshape(Cout, 1)

    # ---- lane-dense NCHW view; pad spatial to a multiple of 128 lanes ----
    HW_pad = ((HW + 127) // 128) * 128
    x = x_nchw.reshape(B, Cin, HW)
    if HW_pad != HW:
        x = jnp.pad(x, ((0, 0), (0, 0), (0, HW_pad - HW)))

    # ---- tile sizing by byte budget (~2 MiB of in+out per grid step) ----
    budget_bytes = 2 * 1024 * 1024
    budget_elems = max(128, budget_bytes // (4 * (Cin + Cout)))   # spatial elems
    TN = min(HW_pad, max(128, (budget_elems // 128) * 128))
    if TN >= HW_pad:
        # Small feature map: whole spatial extent per step; fold batch instead.
        TN = HW_pad
        Bb = max(1, min(B, budget_elems // HW_pad, 8))
    else:
        Bb = 1

    grid = (pl.cdiv(B, Bb), pl.cdiv(HW_pad, TN))

    # ---- explicit scoped-VMEM limit (double-buffered in+out blocks) ----
    step_bytes = 4 * Bb * (Cin + Cout) * TN
    vmem_limit = int(min(64 * 1024 * 1024,
                         max(32 * 1024 * 1024, 4 * step_bytes + (2 << 20))))

    flops = 2 * B * HW * Cin * Cout
    bytes_accessed = 4 * (B * Cin * HW + B * Cout * HW
                          + w_folded.size + shift.size)

    out = pl.pallas_call(
        _make_kernel(Bb),
        out_shape=jax.ShapeDtypeStruct((B, Cout, HW_pad), x.dtype),
        grid_spec=pltpu.PrefetchScalarGridSpec(
            num_scalar_prefetch=0,
            grid=grid,
            in_specs=[
                pl.BlockSpec((Bb, Cin, TN), lambda b, n: (b, 0, n)),
                pl.BlockSpec((Cout, Cin), lambda b, n: (0, 0)),
                pl.BlockSpec((Cout, 1), lambda b, n: (0, 0)),
            ],
            out_specs=pl.BlockSpec((Bb, Cout, TN), lambda b, n: (b, 0, n)),
        ),
        compiler_params=pltpu.CompilerParams(
            dimension_semantics=("parallel", "parallel"),
            vmem_limit_bytes=vmem_limit),
        cost_estimate=pl.CostEstimate(
            flops=flops, transcendentals=0, bytes_accessed=bytes_accessed),
    )(x, w_folded, shift)

    if HW_pad != HW:
        out = out[:, :, :HW]
    return out.reshape(B, Cout, H, W)


def _reference(x_nchw, params, eps=1e-5):
    """Pure-JAX reference (NCHW, eval-mode BN) for correctness check only."""
    y = lax.conv_general_dilated(
        x_nchw, params["w"], window_strides=(1, 1), padding="VALID",
        dimension_numbers=("NCHW", "OIHW", "NCHW"))
    scale = (params["bn_gamma"] /
             jnp.sqrt(params["bn_var"] + eps)).reshape(1, -1, 1, 1)
    shift = (params["bn_beta"] - params["bn_mean"] * params["bn_gamma"] /
             jnp.sqrt(params["bn_var"] + eps)).reshape(1, -1, 1, 1)
    y = y * scale + shift
    return jnp.where(y > 0, y, 0.1 * y)


def _make_params(key, in_channels):
    Cin = in_channels
    Cout = Cin // 2
    ks = jax.random.split(key, 5)
    return {
        "w": jax.random.normal(ks[0], (Cout, Cin, 1, 1), jnp.float32) * 0.1,
        "bn_gamma": jax.random.uniform(ks[1], (Cout,), jnp.float32, 0.5, 1.5),
        "bn_beta": jax.random.normal(ks[2], (Cout,), jnp.float32) * 0.1,
        "bn_mean": jax.random.normal(ks[3], (Cout,), jnp.float32) * 0.1,
        "bn_var": jax.random.uniform(ks[4], (Cout,), jnp.float32, 0.5, 1.5),
    }


if __name__ == "__main__":
    key = jax.random.PRNGKey(0)
    k_x, k_p = jax.random.split(key)

    B, Cin, H, W = 2, 4, 16, 16
    x = jax.random.normal(k_x, (B, Cin, H, W), jnp.float32)
    params = _make_params(k_p, Cin)

    out = feature_out(x, params)
    out = jax.block_until_ready(out)

    ref = _reference(x, params)
    assert out.shape == (B, Cin // 2, H, W)
    assert jnp.allclose(out, ref, rtol=1e-4, atol=1e-4), (
        float(jnp.max(jnp.abs(out - ref))))

    print("KERNEL_OK")
</pallas_src>

<mosaic_0001>
module attributes {stable_mosaic.version = 11 : i64} {
  func.func @kernel(%arg0: i32, %arg1: i32, %arg2: memref<2x4x256xf32, #tpu.memory_space<vmem>>, %arg3: memref<2x4xf32, #tpu.memory_space<vmem>>, %arg4: memref<2x1xf32, #tpu.memory_space<vmem>>, %arg5: memref<2x2x256xf32, #tpu.memory_space<vmem>>) attributes {dimension_semantics = [#tpu.dimension_semantics<parallel>, #tpu.dimension_semantics<parallel>], iteration_bounds = array<i64: 1, 1>, scalar_prefetch = 0 : i64, scratch_operands = 0 : i64, tpu.core_type = #tpu.core_type<tc>, window_params = [{transform_indices = @transform_0, window_bounds = array<i64: 2, 4, 256>}, {pipeline_mode = #tpu.pipeline_mode<synchronous>, transform_indices = @transform_1, window_bounds = array<i64: 2, 4>}, {pipeline_mode = #tpu.pipeline_mode<synchronous>, transform_indices = @transform_2, window_bounds = array<i64: 2, 1>}, {transform_indices = @transform_3, window_bounds = array<i64: 2, 2, 256>}]} {
    %c0 = arith.constant 0 : index
    %c0_0 = arith.constant 0 : index
    %0 = vector.load %arg3[%c0, %c0_0] : memref<2x4xf32, #tpu.memory_space<vmem>>, vector<2x4xf32>
    %c0_1 = arith.constant 0 : index
    %c0_2 = arith.constant 0 : index
    %1 = vector.load %arg4[%c0_1, %c0_2] : memref<2x1xf32, #tpu.memory_space<vmem>>, vector<2x1xf32>
    %c0_3 = arith.constant 0 : index
    %c0_4 = arith.constant 0 : index
    %c0_5 = arith.constant 0 : index
    %2 = vector.load %arg2[%c0_3, %c0_4, %c0_5] : memref<2x4x256xf32, #tpu.memory_space<vmem>>, vector<1x4x256xf32>
    %3 = vector.shape_cast %2 : vector<1x4x256xf32> to vector<4x256xf32>
    %cst = arith.constant dense<0.000000e+00> : vector<2x256xf32>
    %4 = tpu.matmul %0, %3, %cst {dimension_numbers = #tpu.dot_dimension_numbers<[1], [0], [0], [1], [0, 0, 1, 1], [], []>} : vector<2x4xf32>, vector<4x256xf32>, vector<2x256xf32> -> vector<2x256xf32>
    %5 = vector.broadcast %1 : vector<2x1xf32> to vector<2x256xf32>
    %6 = arith.addf %4, %5 : vector<2x256xf32>
    %cst_6 = arith.constant 1.000000e-01 : f32
    %7 = vector.broadcast %cst_6 : f32 to vector<2x256xf32>
    %8 = arith.mulf %7, %6 : vector<2x256xf32>
    %9 = arith.maximumf %6, %8 : vector<2x256xf32>
    %c0_7 = arith.constant 0 : index
    %c0_8 = arith.constant 0 : index
    %c0_9 = arith.constant 0 : index
    %10 = vector.load %arg5[%c0_7, %c0_8, %c0_9] : memref<2x2x256xf32, #tpu.memory_space<vmem>>, vector<1x2x256xf32>
    %11 = vector.shape_cast %10 : vector<1x2x256xf32> to vector<2x256xf32>
    %12 = vector.shape_cast %9 : vector<2x256xf32> to vector<1x2x256xf32>
    tpu.vector_store %arg5[%c0_7, %c0_8, %c0_9], %12 {strides = array<i32>} : memref<2x2x256xf32, #tpu.memory_space<vmem>>, vector<1x2x256xf32>,
    %c1 = arith.constant 1 : index
    %c0_10 = arith.constant 0 : index
    %c0_11 = arith.constant 0 : index
    %13 = vector.load %arg2[%c1, %c0_10, %c0_11] : memref<2x4x256xf32, #tpu.memory_space<vmem>>, vector<1x4x256xf32>
    %14 = vector.shape_cast %13 : vector<1x4x256xf32> to vector<4x256xf32>
    %cst_12 = arith.constant dense<0.000000e+00> : vector<2x256xf32>
    %15 = tpu.matmul %0, %14, %cst_12 {dimension_numbers = #tpu.dot_dimension_numbers<[1], [0], [0], [1], [0, 0, 1, 1], [], []>} : vector<2x4xf32>, vector<4x256xf32>, vector<2x256xf32> -> vector<2x256xf32>
    %16 = vector.broadcast %1 : vector<2x1xf32> to vector<2x256xf32>
    %17 = arith.addf %15, %16 : vector<2x256xf32>
    %cst_13 = arith.constant 1.000000e-01 : f32
    %18 = vector.broadcast %cst_13 : f32 to vector<2x256xf32>
    %19 = arith.mulf %18, %17 : vector<2x256xf32>
    %20 = arith.maximumf %17, %19 : vector<2x256xf32>
    %c1_14 = arith.constant 1 : index
    %c0_15 = arith.constant 0 : index
    %c0_16 = arith.constant 0 : index
    %21 = vector.load %arg5[%c1_14, %c0_15, %c0_16] : memref<2x2x256xf32, #tpu.memory_space<vmem>>, vector<1x2x256xf32>
    %22 = vector.shape_cast %21 : vector<1x2x256xf32> to vector<2x256xf32>
    %23 = vector.shape_cast %20 : vector<2x256xf32> to vector<1x2x256xf32>
    tpu.vector_store %arg5[%c1_14, %c0_15, %c0_16], %23 {strides = array<i32>} : memref<2x2x256xf32, #tpu.memory_space<vmem>>, vector<1x2x256xf32>,
    return
  }
  func.func @transform_0(%arg0: i32, %arg1: i32) -> (i32, i32, i32) {
    %c0_i32 = arith.constant 0 : i32
    %c0_i32_0 = arith.constant 0 : i32
    return %arg0, %c0_i32, %arg1 : i32, i32, i32
  }
  func.func @transform_1(%arg0: i32, %arg1: i32) -> (i32, i32) {
    %c0_i32 = arith.constant 0 : i32
    %c0_i32_0 = arith.constant 0 : i32
    %c0_i32_1 = arith.constant 0 : i32
    return %c0_i32, %c0_i32_0 : i32, i32
  }
  func.func @transform_2(%arg0: i32, %arg1: i32) -> (i32, i32) {
    %c0_i32 = arith.constant 0 : i32
    %c0_i32_0 = arith.constant 0 : i32
    %c0_i32_1 = arith.constant 0 : i32
    return %c0_i32, %c0_i32_0 : i32, i32
  }
  func.func @transform_3(%arg0: i32, %arg1: i32) -> (i32, i32, i32) {
    %c0_i32 = arith.constant 0 : i32
    %c0_i32_0 = arith.constant 0 : i32
    return %arg0, %c0_i32, %arg1 : i32, i32, i32
  }
}

</mosaic_0001>

<bundles_post_ra>
// kernel: tpu_custom_call.1
= control target key start
LH: loop header
LB: loop body
LE: loop exit
PB: predicated region body
PF: predicated region fallthrough
CT: control target
= control target key end

     0   :  { %8 = vsyncpa [#allocation3], 0  ;;  %s292_s0 = inlined_call_operand.hbm [shape: f32[2,4,256], index: 0, kind: input, shape index: {}]   ;;  %s293_s1 = inlined_call_operand.vmem [shape: f32[2,4], index: 1, kind: input, shape index: {}]   ;;  %s294_s2 = inlined_call_operand.vmem [shape: f32[2,1], index: 2, kind: input, shape index: {}]   ;;  %s295_s3 = inlined_call_operand.hbm [shape: f32[2,2,256], index: 3, kind: output, shape index: {}]  }
   0x1   :  { %9 = vsyncpa [#allocation4], 0  ;;  %s14_s14 = sshll.u32 %s292_s0, 4  ;;  %s251_s15 = smov [#allocation2]   ;;  %s15_s14 = int_to_ptr.hbm [resolvable:$true] %s14_s14 }
   0x2   :  { %s16_s16 = sshll.u32 %s251_s15, 4  ;;  %s252_s17 = smov 128   ;;  %s17_s16 = int_to_ptr.vmem [resolvable:$true] %s16_s16 }
   0x3   :  { %s253_s18 = smov 8  }
   0x4   :  { %22 = dma.hbm_to_vmem [thread:$0]  %s15_s14, 256, %s17_s16, [#allocation3], %s252_s17, %s252_s17, %s253_s18  }
   0x5   :  { %247 = dma.done.wait [#allocation3], 256  }
   0x6   :  { %248 = vsyncadd [#allocation3], 4294967040  ;;  %v254_v0 = vmov 0   ;;  %v33_v1 = vld [vmem:[#allocation2] sm:$0xff]  ;;  %v32_v2 = vld [vmem:[%s294_s2] sm:$0x3] }
   0x7   :  { %198 = vset.pattern.permute.xlu0 %v254_v0  ;;  %40 = vst [vmem:[#allocation1] ss:$2 sm:$0xff] %v33_v1  ;;  %v104_v3 = vld [vmem:[#allocation2 + $0x8] sm:$0xff]  ;;  %vm47_vm0 = vcmask 1043456   ;;  %v31_v6 = vld [vmem:[%s293_s1] sm:$0x3] }
   0x8   :  { %36 = vperm.xlu0 %198, %v32_v2   ;;  %vm43_vm1 = vcmask 31744   ;;  %vm99_vm2 = vcmask 1041408   ;;  %s255_s1 = smov [#allocation5]   ;;  %s170_s24 = sshll.u32 %s295_s3, 4  ;;  %s171_s24 = int_to_ptr.hbm [resolvable:$true] %s170_s24 }
   0x9   :  { %s168_s2 = sshll.u32 %s255_s1, 4  ;;  %s256_s25 = smov 64   ;;  %s169_s2 = int_to_ptr.vmem [resolvable:$true] %s168_s2 }
   0xa   :  { %s257_s26 = smov 4  }
   0xe   :  { %v41_v4 = vld.sshfl [vmem:[#allocation1] sm:$0xff pattern:$0x75316420]  ;;  %v42_v5 = vld.sshfl [vmem:[#allocation1 + $0x8] sm:$0xff pattern:$0x75316420] }
   0xf   :  { %106 = vst [vmem:[#allocation1] ss:$2 sm:$0xff] %v104_v3  ;;  %185 = vmatpush.msk.msra.mxu1 %vm47_vm0, %v42_v5  ;;  %183 = vmatpush.msk.msra.mxu0 %vm47_vm0, %v41_v4 }
  0x10   :  { %186 = vmatmul.msk.f32.vlgmr.msra.gmra.mxu1 %vm43_vm1, %v31_v6  ;;  %184 = vmatmul.msk.f32.vlgmr.msra.gmra.mxu0 %vm43_vm1, %v31_v6 }
  0x16   :  { %v107_v7 = vld.sshfl [vmem:[#allocation1] sm:$0xff pattern:$0x75316420]  ;;  %v108_v8 = vld.sshfl [vmem:[#allocation1 + $0x8] sm:$0xff pattern:$0x75316420] }
  0x17   :  { %187 = vmatpush.msk.msra.mxu2 %vm47_vm0, %v107_v7  ;;  %189 = vmatpush.msk.msra.mxu3 %vm47_vm0, %v108_v8 }
  0x18   :  { %188 = vmatmul.msk.f32.vlgmr.msra.gmra.mxu2 %vm43_vm1, %v31_v6  ;;  %190 = vmatmul.msk.f32.vlgmr.msra.gmra.mxu3 %vm43_vm1, %v31_v6 }
  0x7a   :  { %v37_v9 = vpop.permute.xlu0 %36 }
  0x8d   :  { %v89_v10 = vpop.f32.mrf.mxu1  ;;  %v69_v11 = vpop.f32.mrf.mxu0 }
  0x8e   :  { %v90_v12 = vadd.f32 %v89_v10, %v37_v9  ;;  %v70_v13 = vadd.f32 %v69_v11, %v37_v9 }
  0x90   :  { %v93_v14 = vmul.f32 0.1, %v90_v12  ;;  %v92_v15 = vmul.f32 0.1, %v70_v13 }
  0x92   :  { %v95_v16 = vmax.f32 %v90_v12, %v93_v14  ;;  %v94_v17 = vmax.f32 %v70_v13, %v92_v15 }
  0x94   :  { %v98_v18 = vrot.slane %v95_v16, 6 }
  0x96   :  { %v100_v19 = vsel %vm99_vm2, %v94_v17, %v98_v18 }
  0x97   :  { %102 = vst [vmem:[#allocation5] sm:$0xf] %v100_v19 }
  0x9b   :  { %v130_v20 = vpop.f32.mrf.mxu2  ;;  %v150_v21 = vpop.f32.mrf.mxu3 }
  0x9c   :  { %v131_v22 = vadd.f32 %v130_v20, %v37_v9  ;;  %v151_v23 = vadd.f32 %v150_v21, %v37_v9 }
  0x9e   :  { %v153_v24 = vmul.f32 0.1, %v131_v22  ;;  %v154_v25 = vmul.f32 0.1, %v151_v23 }
  0xa0   :  { %v156_v26 = vmax.f32 %v151_v23, %v154_v25  ;;  %v155_v27 = vmax.f32 %v131_v22, %v153_v24 }
  0xa2   :  { %v159_v28 = vrot.slane %v156_v26, 6 }
  0xa4   :  { %v160_v29 = vsel %vm99_vm2, %v155_v27, %v159_v28 }
  0xa5   :  { %163 = vst [vmem:[#allocation5 + $0x4] sm:$0xf] %v160_v29 }
  0xa6   :  { %176 = dma.vmem_to_hbm [thread:$0]  %s169_s2, 128, %s171_s24, [#allocation4], %s256_s25, %s256_s25, %s257_s26  }
  0xa7   :  { %249 = dma.done.wait [#allocation4], 128  }
  0xa8   :  { %250 = vsyncadd [#allocation4], 4294967168 }
  0xa9   :  { %181 = vsyncpa [#allocation3], 1 }
  0xaa   :  { %182 = vsyncpa [#allocation4], 1 }

</bundles_post_ra>
